<compile_context>
chip_gen: v5e
topology: v5e:2x2
jax: 0.10.0
libtpu: 0.0.40
codegen_flags: <defaults>
</compile_context>

<pallas_src>
import functools
import math

import jax
import jax.numpy as jnp
from jax.experimental import pallas as pl
from jax.experimental.pallas import tpu as pltpu


# ----------------------------------------------------------------------------- helpers
def _round_up(x, m):
    return ((x + m - 1) // m) * m


def _pick_block(dim, cap, mult, prefer_split=False):
    """Return (block, padded_dim).

    - dim <= cap: use the full dim as a single block (always a legal Mosaic block),
      optionally split in two so both v7x TensorCores get work on 'parallel' axes.
    - dim  > cap: prefer a multiple-of-`mult` block in [cap//2, cap] that divides dim
      exactly (no padding); otherwise fall back to `cap` with padding.
    VMEM budget for the resulting tiles stays ~<7 MiB, safe for v5e/v6e/v7x defaults.
    """
    if dim <= cap:
        if prefer_split and dim >= 2 * mult and dim % 2 == 0 and (dim // 2) % mult == 0:
            return dim // 2, dim
        return dim, dim
    hi = cap - cap % mult
    lo = max(cap // 2, mult)
    for cand in range(hi, lo - 1, -mult):
        if dim % cand == 0:
            return cand, dim
    return hi, _round_up(dim, hi)


# -------------------------------------------------------- fused matmul (+BN shift/res/ReLU)
def _mm_epilogue_kernel(a_ref, b_ref, s_ref, o_ref, acc_ref, *, relu):
    @pl.when(pl.program_id(2) == 0)
    def _():
        acc_ref[...] = jnp.zeros_like(acc_ref)

    acc_ref[...] += jnp.dot(a_ref[...], b_ref[...],
                            preferred_element_type=jnp.float32)

    @pl.when(pl.program_id(2) == pl.num_programs(2) - 1)
    def _():
        y = acc_ref[...] + s_ref[...]          # folded-BN shift / bias (f32)
        if relu:
            y = jnp.maximum(y, 0.0)
        o_ref[...] = y.astype(o_ref.dtype)


def _mm_epilogue_res_kernel(a_ref, b_ref, s_ref, r_ref, o_ref, acc_ref, *, relu):
    @pl.when(pl.program_id(2) == 0)
    def _():
        acc_ref[...] = jnp.zeros_like(acc_ref)

    acc_ref[...] += jnp.dot(a_ref[...], b_ref[...],
                            preferred_element_type=jnp.float32)

    @pl.when(pl.program_id(2) == pl.num_programs(2) - 1)
    def _():
        y = acc_ref[...] + s_ref[...] + r_ref[...].astype(jnp.float32)
        if relu:
            y = jnp.maximum(y, 0.0)
        o_ref[...] = y.astype(o_ref.dtype)


def matmul_fused(a, b, shift, residual=None, relu=True, out_dtype=jnp.bfloat16):
    """(M,K) @ (K,N) on the MXU with bf16 operands / f32 accumulation, with the
    BN shift (+residual) (+ReLU) epilogue applied inside the last K grid step."""
    M, K = a.shape
    K2, Nc = b.shape
    assert K == K2
    a = a.astype(jnp.bfloat16)
    b = b.astype(jnp.bfloat16)

    bm, Mp = _pick_block(M, 512, 16, prefer_split=True)   # bf16 sublane packing -> mult 16
    bk, Kp = _pick_block(K, 1280, 128)
    bn, Np = _pick_block(Nc, 512, 128)

    if (Mp, Kp) != (M, K):
        a = jnp.pad(a, ((0, Mp - M), (0, Kp - K)))
    if (Kp, Np) != (K, Nc):
        b = jnp.pad(b, ((0, Kp - K), (0, Np - Nc)))
    s2 = shift.astype(jnp.float32).reshape(1, Nc)
    if Np != Nc:
        s2 = jnp.pad(s2, ((0, 0), (0, Np - Nc)))

    a_spec = pl.BlockSpec((bm, bk), lambda i, j, k: (i, k))
    b_spec = pl.BlockSpec((bk, bn), lambda i, j, k: (k, j))
    s_spec = pl.BlockSpec((1, bn), lambda i, j, k: (0, j))
    o_spec = pl.BlockSpec((bm, bn), lambda i, j, k: (i, j))

    if residual is not None:
        r = residual.astype(jnp.bfloat16)      # epilogue math stays f32
        if (Mp, Np) != (M, Nc):
            r = jnp.pad(r, ((0, Mp - M), (0, Np - Nc)))
        kern = functools.partial(_mm_epilogue_res_kernel, relu=relu)
        operands = (a, b, s2, r)
        in_specs = [a_spec, b_spec, s_spec,
                    pl.BlockSpec((bm, bn), lambda i, j, k: (i, j))]
    else:
        kern = functools.partial(_mm_epilogue_kernel, relu=relu)
        operands = (a, b, s2)
        in_specs = [a_spec, b_spec, s_spec]

    out = pl.pallas_call(
        kern,
        out_shape=jax.ShapeDtypeStruct((Mp, Np), out_dtype),
        grid=(Mp // bm, Np // bn, Kp // bk),
        in_specs=in_specs,
        out_specs=o_spec,
        scratch_shapes=[pltpu.VMEM((bm, bn), jnp.float32)],
        compiler_params=pltpu.CompilerParams(
            dimension_semantics=("parallel", "parallel", "arbitrary")),
    )(*operands)
    if (Mp, Np) != (M, Nc):
        out = out[:M, :Nc]
    return out


# ----------------------------------------------------------------------------- conv (fused)
def conv2d_fused(x, wm, shift, ksize, stride, pad, residual=None, relu=True,
                 out_dtype=jnp.bfloat16):
    """x: NHWC bf16; wm: (k*k*Cin, Cout) bf16 with inference-BN folded into it;
    shift: (Cout,) f32.  im2col (glue) + fused Pallas matmul epilogue."""
    N, H, W, C = x.shape
    if ksize == 1:
        if stride > 1:
            x = x[:, ::stride, ::stride, :]
        OH, OW = x.shape[1], x.shape[2]
        cols = x.reshape(N * OH * OW, C)
    else:
        # TODO(synk): im2col is still materialized in HBM (now bf16); moving the k*k
        # taps onto the matmul K grid axis via shifted-window DMA would remove the blow-up.
        xp = jnp.pad(x, ((0, 0), (pad, pad), (pad, pad), (0, 0)))
        Hp, Wp = H + 2 * pad, W + 2 * pad
        OH = (Hp - ksize) // stride + 1
        OW = (Wp - ksize) // stride + 1
        patches = [xp[:, i:i + stride * OH:stride, j:j + stride * OW:stride, :]
                   for i in range(ksize) for j in range(ksize)]
        cols = jnp.stack(patches, axis=3).reshape(N * OH * OW, ksize * ksize * C)
    res2 = residual.reshape(N * OH * OW, -1) if residual is not None else None
    y = matmul_fused(cols, wm, shift, residual=res2, relu=relu, out_dtype=out_dtype)
    return y.reshape(N, OH, OW, -1)


# ----------------------------------------------------------------------------- pooling
def _max9_kernel(*refs):
    o_ref = refs[-1]
    m = refs[0][...]
    for r in refs[1:9]:
        m = jnp.maximum(m, r[...])
    o_ref[...] = m


def maxpool_3x3_s2_p1(x):
    N, H, W, C = x.shape
    xp = jnp.pad(x, ((0, 0), (1, 1), (1, 1), (0, 0)), constant_values=-jnp.inf)
    OH = (H + 2 - 3) // 2 + 1
    OW = (W + 2 - 3) // 2 + 1
    R = N * OH * OW
    # Lane-dense layout: fold small channel counts (C=64) up to 128 lanes.
    if C < 128 and (R * C) % 128 == 0:
        R2, C2 = (R * C) // 128, 128
    else:
        R2, C2 = R, C
    views = [xp[:, i:i + 2 * OH:2, j:j + 2 * OW:2, :].reshape(R2, C2)
             for i in range(3) for j in range(3)]
    tr = min(1024, _round_up(R2, 8))
    Rp = _round_up(R2, tr)
    if Rp != R2:
        views = [jnp.pad(v, ((0, Rp - R2), (0, 0))) for v in views]
    spec = pl.BlockSpec((tr, C2), lambda i: (i, 0))
    out = pl.pallas_call(
        _max9_kernel,
        out_shape=jax.ShapeDtypeStruct((Rp, C2), x.dtype),
        grid=(Rp // tr,),
        in_specs=[spec] * 9,
        out_specs=spec,
        compiler_params=pltpu.CompilerParams(dimension_semantics=("parallel",)),
    )(*views)
    return out[:R2].reshape(N, OH, OW, C)


def _gap_kernel(x_ref, o_ref):
    o_ref[...] = jnp.mean(x_ref[...].astype(jnp.float32), axis=1, keepdims=True)


def global_avg_pool(x):
    """Adaptive average pool to 1x1: NHWC bf16 -> (N, C) f32."""
    N, H, W, C = x.shape
    xr = x.reshape(N, H * W, C)
    out = pl.pallas_call(
        _gap_kernel,
        out_shape=jax.ShapeDtypeStruct((N, 1, C), jnp.float32),
        grid=(N,),
        in_specs=[pl.BlockSpec((1, H * W, C), lambda i: (i, 0, 0))],
        out_specs=pl.BlockSpec((1, 1, C), lambda i: (i, 0, 0)),
        compiler_params=pltpu.CompilerParams(dimension_semantics=("parallel",)),
    )(xr)
    return out.reshape(N, C)


# ----------------------------------------------------------------------------- params
def init_params(key, num_classes=10):
    # Random ResNet-50-shaped weights in PyTorch layout (pretrained weights not loadable here).
    cnt = [0]

    def nxt():
        cnt[0] += 1
        return jax.random.fold_in(key, cnt[0])

    def conv_w(cout, cin, kh, kw):
        std = math.sqrt(2.0 / (cin * kh * kw))
        return jax.random.normal(nxt(), (cout, cin, kh, kw), jnp.float32) * std

    def bn_p(c):
        return dict(
            gamma=1.0 + 0.05 * jax.random.normal(nxt(), (c,), jnp.float32),
            beta=0.05 * jax.random.normal(nxt(), (c,), jnp.float32),
            mean=0.05 * jax.random.normal(nxt(), (c,), jnp.float32),
            var=1.0 + 0.05 * jnp.abs(jax.random.normal(nxt(), (c,), jnp.float32)),
        )

    params = dict(conv1_w=conv_w(64, 3, 7, 7), bn1=bn_p(64))
    in_ch = 64
    layers = []
    for (mid, blocks, stride) in [(64, 3, 1), (128, 4, 2), (256, 6, 2), (512, 3, 2)]:
        blks = []
        for b in range(blocks):
            s = stride if b == 0 else 1
            blk = dict(
                conv1_w=conv_w(mid, in_ch, 1, 1), bn1=bn_p(mid),
                conv2_w=conv_w(mid, mid, 3, 3), bn2=bn_p(mid),
                conv3_w=conv_w(mid * 4, mid, 1, 1), bn3=bn_p(mid * 4),
                stride=s,
            )
            if b == 0:
                blk['down_w'] = conv_w(mid * 4, in_ch, 1, 1)
                blk['down_bn'] = bn_p(mid * 4)
            blks.append(blk)
            in_ch = mid * 4
        layers.append(blks)
    params['layers'] = layers
    params['fc_w'] = jax.random.normal(nxt(), (num_classes, 2048), jnp.float32) \
        * math.sqrt(1.0 / 2048)
    params['fc_b'] = 0.01 * jax.random.normal(nxt(), (num_classes,), jnp.float32)
    return params


def _fold_bn(w, bn, eps=1e-5):
    """Fold inference BatchNorm into the conv weight; return ((k*k*Cin, Cout) bf16, shift f32)."""
    scale = bn['gamma'] / jnp.sqrt(bn['var'] + eps)          # (Cout,)
    shift = (bn['beta'] - bn['mean'] * scale).astype(jnp.float32)
    cout, cin, kh, kw = w.shape
    wf = w * scale[:, None, None, None]
    wm = jnp.transpose(wf, (2, 3, 1, 0)).reshape(kh * kw * cin, cout).astype(jnp.bfloat16)
    return wm, shift


def prepare_params(params):
    """One-time: fold BN, reshape weights to matmul layout, cast to bf16."""
    prep = dict()
    prep['stem_wm'], prep['stem_shift'] = _fold_bn(params['conv1_w'], params['bn1'])
    layers = []
    for blks in params['layers']:
        pblks = []
        for blk in blks:
            pb = dict(stride=blk['stride'])
            pb['c1_wm'], pb['c1_shift'] = _fold_bn(blk['conv1_w'], blk['bn1'])
            pb['c2_wm'], pb['c2_shift'] = _fold_bn(blk['conv2_w'], blk['bn2'])
            pb['c3_wm'], pb['c3_shift'] = _fold_bn(blk['conv3_w'], blk['bn3'])
            if 'down_w' in blk:
                pb['dw_wm'], pb['dw_shift'] = _fold_bn(blk['down_w'], blk['down_bn'])
            pblks.append(pb)
        layers.append(pblks)
    prep['layers'] = layers
    prep['fc_wm'] = params['fc_w'].T.astype(jnp.bfloat16)     # (2048, num_classes)
    prep['fc_shift'] = params['fc_b'].astype(jnp.float32)
    return prep


# ----------------------------------------------------------------------------- model
def bottleneck(x, p):
    s = p['stride']
    out = conv2d_fused(x, p['c1_wm'], p['c1_shift'], 1, 1, 0, relu=True)
    out = conv2d_fused(out, p['c2_wm'], p['c2_shift'], 3, s, 1, relu=True)   # stride on conv2 (v1.5)
    if 'dw_wm' in p:
        identity = conv2d_fused(x, p['dw_wm'], p['dw_shift'], 1, s, 0, relu=False)
    else:
        identity = x
    # conv3 + BN3 + residual add + ReLU fused into one matmul epilogue
    return conv2d_fused(out, p['c3_wm'], p['c3_shift'], 1, 1, 0,
                        residual=identity, relu=True)


def feat_ext_resnet50_forward(prep, x_nchw):
    # NCHW (PyTorch) -> NHWC; activations kept in bf16, all matmul accumulation in f32.
    x = jnp.transpose(x_nchw, (0, 2, 3, 1)).astype(jnp.bfloat16)
    x = conv2d_fused(x, prep['stem_wm'], prep['stem_shift'], 7, 2, 3, relu=True)
    x = maxpool_3x3_s2_p1(x)
    for blks in prep['layers']:
        for p in blks:
            x = bottleneck(x, p)
    feat = global_avg_pool(x)                                # (N, 2048) f32
    # TODO(synk): nn.Dropout(0.5) is identity in eval mode; train-mode RNG masking not applied.
    logits = matmul_fused(feat, prep['fc_wm'], prep['fc_shift'],
                          relu=False, out_dtype=jnp.float32)
    return logits


# ----------------------------------------------------------------------------- main
if __name__ == "__main__":
    key = jax.random.PRNGKey(0)
    params = init_params(jax.random.fold_in(key, 1), num_classes=10)
    prep = prepare_params(params)
    # Small but valid input: ResNet-50 needs 3 channels; 32x32 survives the 5 downsamplings.
    x = jax.random.normal(jax.random.fold_in(key, 2), (2, 3, 32, 32), jnp.float32)
    out = feat_ext_resnet50_forward(prep, x)
    out = jax.block_until_ready(out)
    assert out.shape == (2, 10) and out.dtype == jnp.float32
    assert bool(jnp.all(jnp.isfinite(out)))
    print("KERNEL_OK")
</pallas_src>

<mosaic_0001>
module attributes {stable_mosaic.version = 11 : i64} {
  func.func @_mm_epilogue_kernel(%arg0: i32, %arg1: i32, %arg2: i32, %arg3: memref<256x147xbf16, #tpu.memory_space<vmem>>, %arg4: memref<147x64xbf16, #tpu.memory_space<vmem>>, %arg5: memref<1x64xf32, #tpu.memory_space<vmem>>, %arg6: memref<256x64xbf16, #tpu.memory_space<vmem>>, %arg7: memref<256x64xf32, #tpu.memory_space<vmem>>) attributes {dimension_semantics = [#tpu.dimension_semantics<parallel>, #tpu.dimension_semantics<parallel>, #tpu.dimension_semantics<arbitrary>], iteration_bounds = array<i64: 2, 1, 1>, scalar_prefetch = 0 : i64, scratch_operands = 1 : i64, tpu.core_type = #tpu.core_type<tc>, window_params = [{transform_indices = @transform_0, window_bounds = array<i64: 256, 147>}, {transform_indices = @transform_1, window_bounds = array<i64: 147, 64>}, {transform_indices = @transform_2, window_bounds = array<i64: 1, 64>}, {transform_indices = @transform_3, window_bounds = array<i64: 256, 64>}]} {
    %c0_i32 = arith.constant 0 : i32
    %0 = arith.cmpi eq, %arg2, %c0_i32 : i32
    %1 = arith.extui %0 : i1 to i32
    %c0_i32_0 = arith.constant 0 : i32
    %2 = arith.cmpi ne, %1, %c0_i32_0 : i32
    scf.if %2 {
      %cst_10 = arith.constant 0.000000e+00 : f32
      %12 = vector.broadcast %cst_10 : f32 to vector<256x64xf32>
      %c0_11 = arith.constant 0 : index
      %c0_12 = arith.constant 0 : index
      %13 = vector.load %arg7[%c0_11, %c0_12] : memref<256x64xf32, #tpu.memory_space<vmem>>, vector<256x64xf32>
      tpu.vector_store %arg7[%c0_11, %c0_12], %12 {strides = array<i32>} : memref<256x64xf32, #tpu.memory_space<vmem>>, vector<256x64xf32>,
    } else {
    }
    %c0 = arith.constant 0 : index
    %c0_1 = arith.constant 0 : index
    %3 = vector.load %arg7[%c0, %c0_1] : memref<256x64xf32, #tpu.memory_space<vmem>>, vector<256x64xf32>
    %c0_2 = arith.constant 0 : index
    %c0_3 = arith.constant 0 : index
    %4 = vector.load %arg3[%c0_2, %c0_3] : memref<256x147xbf16, #tpu.memory_space<vmem>>, vector<256x147xbf16>
    %c0_4 = arith.constant 0 : index
    %c0_5 = arith.constant 0 : index
    %5 = vector.load %arg4[%c0_4, %c0_5] : memref<147x64xbf16, #tpu.memory_space<vmem>>, vector<147x64xbf16>
    %cst = arith.constant dense<0.000000e+00> : vector<256x64xf32>
    %6 = tpu.matmul %4, %5, %cst {dimension_numbers = #tpu.dot_dimension_numbers<[1], [0], [0], [1], [0, 0, 1, 1], [], []>} : vector<256x147xbf16>, vector<147x64xbf16>, vector<256x64xf32> -> vector<256x64xf32>
    %7 = arith.addf %3, %6 : vector<256x64xf32>
    %c0_6 = arith.constant 0 : index
    %c0_7 = arith.constant 0 : index
    %8 = vector.load %arg7[%c0_6, %c0_7] : memref<256x64xf32, #tpu.memory_space<vmem>>, vector<256x64xf32>
    tpu.vector_store %arg7[%c0_6, %c0_7], %7 {strides = array<i32>} : memref<256x64xf32, #tpu.memory_space<vmem>>, vector<256x64xf32>,
    %c0_i32_8 = arith.constant 0 : i32
    %9 = arith.cmpi eq, %arg2, %c0_i32_8 : i32
    %10 = arith.extui %9 : i1 to i32
    %c0_i32_9 = arith.constant 0 : i32
    %11 = arith.cmpi ne, %10, %c0_i32_9 : i32
    scf.if %11 {
      %c0_10 = arith.constant 0 : index
      %c0_11 = arith.constant 0 : index
      %12 = vector.load %arg7[%c0_10, %c0_11] : memref<256x64xf32, #tpu.memory_space<vmem>>, vector<256x64xf32>
      %c0_12 = arith.constant 0 : index
      %c0_13 = arith.constant 0 : index
      %13 = vector.load %arg5[%c0_12, %c0_13] : memref<1x64xf32, #tpu.memory_space<vmem>>, vector<1x64xf32>
      %14 = vector.broadcast %13 : vector<1x64xf32> to vector<256x64xf32>
      %15 = arith.addf %12, %14 : vector<256x64xf32>
      %cst_14 = arith.constant 0.000000e+00 : f32
      %16 = vector.broadcast %cst_14 : f32 to vector<256x64xf32>
      %17 = arith.maximumf %15, %16 : vector<256x64xf32>
      %18 = arith.truncf %17 : vector<256x64xf32> to vector<256x64xbf16>
      %c0_15 = arith.constant 0 : index
      %c0_16 = arith.constant 0 : index
      %19 = vector.load %arg6[%c0_15, %c0_16] : memref<256x64xbf16, #tpu.memory_space<vmem>>, vector<256x64xbf16>
      tpu.vector_store %arg6[%c0_15, %c0_16], %18 {strides = array<i32>} : memref<256x64xbf16, #tpu.memory_space<vmem>>, vector<256x64xbf16>,
    } else {
    }
    return
  }
  func.func @transform_0(%arg0: i32, %arg1: i32, %arg2: i32) -> (i32, i32) {
    %c0_i32 = arith.constant 0 : i32
    return %arg0, %arg2 : i32, i32
  }
  func.func @transform_1(%arg0: i32, %arg1: i32, %arg2: i32) -> (i32, i32) {
    %c0_i32 = arith.constant 0 : i32
    return %arg2, %arg1 : i32, i32
  }
  func.func @transform_2(%arg0: i32, %arg1: i32, %arg2: i32) -> (i32, i32) {
    %c0_i32 = arith.constant 0 : i32
    %c0_i32_0 = arith.constant 0 : i32
    return %c0_i32, %arg1 : i32, i32
  }
  func.func @transform_3(%arg0: i32, %arg1: i32, %arg2: i32) -> (i32, i32) {
    %c0_i32 = arith.constant 0 : i32
    return %arg0, %arg1 : i32, i32
  }
}

</mosaic_0001>

<bundles_post_ra>
// kernel: tpu_custom_call.1
= control target key start
LH: loop header
LB: loop body
LE: loop exit
PB: predicated region body
PF: predicated region fallthrough
CT: control target
= control target key end

     0   :  { %s1489_s12 = smov 0   ;;  %s1491_s13 = smov 0   ;;  %s1811_s0 = inlined_call_operand.vmem [shape: bf16[512,147], index: 0, kind: input, shape index: {}]   ;;  %s1812_s1 = inlined_call_operand.vmem [shape: bf16[147,64], index: 1, kind: input, shape index: {}]   ;;  %s1813_s2 = inlined_call_operand.vmem [shape: f32[1,64], index: 2, kind: input, shape index: {}]   ;;  %s1814_s3 = inlined_call_operand.vmem [shape: bf16[512,64], index: 3, kind: output, shape index: {}]  }
   0x1   :  { %s1493_s14 = smov 0  }
   0x2 LB: > { %s32_s15 = sadd.s32 1, %s1461_s13  ;;  %p1176_p0 = scmp.ge.s32.totalorder %s1465_s14, 1  ;;  %s1465_s14 = sphi %s1493_s14, %s13_s14   ;;  %s1461_s13 = sphi %s1491_s13, %s1816_s13   ;;  %s1457_s12 = sphi %s1489_s12, %s1815_s12  }
   0x3   : > { %p34_p1 = scmp.ge.s32.totalorder %s32_s15, 2  ;;  %p191_p2 = scmp.lt.s32.totalorder %s1465_s14, 3 }
   0x5   : > { %s1818_s15 = smov (%p34_p1, %s32_s15), 0  ;;  %p192_p3 = pnand %p1176_p0, %p191_p2 }
   0x6   : > { %s1177_s20 = sshll.u32 (!%p192_p3), %s1457_s12, 5 }
   0x7   : > { %195 = sbr.rel (%p192_p3) target bundleno = 317 (0x13d), region = 32  ;;  %p236_p4 = scmp.lt.s32.totalorder (!%p192_p3), %s1177_s20, 63 }
   0xc   : > { %v1404_v0 = vld [vmem:[%s1812_s1 + $0x38] sm:$0xff]  ;;  %v387_v1 = vld [vmem:[%s1812_s1 + $0x48] sm:$0x3]  ;;  %vm638_vm0 = vcmask 1040384   ;;  %vm639_vm1 = vcmask 1041408   ;;  %v1403_v3 = vld [vmem:[%s1812_s1 + $0x30] sm:$0xff] }
   0xd   : > { %v569_v2 = vunpack.c.l.b16 %v387_v1  ;;  %645 = vmatpush.bf16.msra.mxu0 %v1404_v0  ;;  %1406 = vmatpush.bf16.msra.mxu2 %v1404_v0  ;;  %v1467_v4 = vmov 65535   ;;  %s1820_s20 = smov (!%p236_p4, %s1177_s20), 63  ;;  %v1402_v9 = vld [vmem:[%s1812_s1 + $0x28] sm:$0xff]  ;;  %v1405_v10 = vld [vmem:[%s1812_s1 + $0x40] sm:$0xff]  ;;  %vm589_vm2 = vcmask 154624   ;;  %v1400_v18 = vld [vmem:[%s1812_s1 + $0x18] sm:$0xff] }
   0xe   : > { %v640_v5 = vsel %vm638_vm0, 4294967295, %v1467_v4  ;;  %s1364_s25 = sshll.u32 %s1820_s20, 3  ;;  %v1401_v14 = vld [vmem:[%s1812_s1 + $0x20] sm:$0xff]  ;;  %v1399_v19 = vld [vmem:[%s1812_s1 + $0x10] sm:$0xff]  ;;  %v1398_v20 = vld [vmem:[%s1812_s1 + $0x8] sm:$0xff]  ;;  %vm272_vm3 = vcmask 523264  }
   0xf   : > { %v579_v6 = vpack.c.b16 %v569_v2, %v569_v2  ;;  %v641_v7 = vsel %vm639_vm1, %v640_v5, 0  ;;  %s1528_s30 = scalar_lea.vmem %s1811_s0, %s1364_s25  ;;  %v1397_v26 = vld [vmem:[%s1812_s1] sm:$0xff]  ;;  %s1181_s19 = sshll.u32 %s1820_s20, 2  ;;  %vm1023_vm4 = vcmask 519168  }
  0x10   : > { %v1365_v11 = vld [vmem:[%s1528_s30 + $0x4] sm:$0xf]  ;;  %v1186_v12 = vld [vmem:[%s1528_s30 + $0x8] sm:$0xf0]  ;;  %v1383_v15 = vld [vmem:[%s1528_s30 + $0x94] sm:$0xf]  ;;  %s1673_s23 = scalar_lea.vmem %s1814_s3, %s1181_s19 }
  0x11   : > { %v643_v8 = vand.u32 %v641_v7, %v579_v6  ;;  %646 = vmatpush.bf16.msra.mxu0 %v1403_v3  ;;  %1407 = vmatpush.bf16.msra.mxu2 %v1403_v3  ;;  %v1189_v13 = vor.u32 %v1365_v11, %v1186_v12  ;;  %v1258_v16 = vld [vmem:[%s1528_s30 + $0x98] sm:$0xf0]  ;;  %v1367_v21 = vld [vmem:[%s1528_s30 + $0x14] sm:$0xf]  ;;  %v1385_v23 = vld [vmem:[%s1528_s30 + $0xa4] sm:$0xf] }
  0x12   : > { %v1261_v17 = vor.u32 %v1383_v15, %v1258_v16  ;;  %v1194_v22 = vld [vmem:[%s1528_s30 + $0x18] sm:$0xf0]  ;;  %v1266_v24 = vld [vmem:[%s1528_s30 + $0xa8] sm:$0xf0]  ;;  %v1184_v27 = vld [vmem:[%s1528_s30] sm:$0xf] }
  0x13   : > { %740 = vmatpush.bf16.msra.mxu1 %v643_v8  ;;  %1414 = vmatpush.bf16.msra.mxu3 %v643_v8  ;;  %v1197_v25 = vor.u32 %v1367_v21, %v1194_v22  ;;  %v1366_v28 = vld [vmem:[%s1528_s30 + $0x4] sm:$0xf0]  ;;  %v1248_v29 = vld [vmem:[%s1528_s30 + $0x80] sm:$0xf]  ;;  %v1269_v31 = vor.u32 %v1385_v23, %v1266_v24  ;;  %v1369_v34 = vld [vmem:[%s1528_s30 + $0x24] sm:$0xf] }
  0x14   : > { %v1382_v30 = vld [vmem:[%s1528_s30 + $0x84] sm:$0xf0]  ;;  %v1185_v32 = vor.u32 %v1366_v28, %v1184_v27  ;;  %v1202_v35 = vld [vmem:[%s1528_s30 + $0x28] sm:$0xf0]  ;;  %v1387_v36 = vld [vmem:[%s1528_s30 + $0xb4] sm:$0xf] }
  0x15   : > { %647 = vmatpush.bf16.msra.mxu0 %v1402_v9  ;;  %1408 = vmatpush.bf16.msra.mxu2 %v1402_v9  ;;  %v1249_v33 = vor.u32 %v1382_v30, %v1248_v29  ;;  %v1274_v37 = vld [vmem:[%s1528_s30 + $0xb8] sm:$0xf0]  ;;  %v1205_v38 = vor.u32 %v1369_v34, %v1202_v35  ;;  %v1192_v39 = vld [vmem:[%s1528_s30 + $0x10] sm:$0xf]  ;;  %v1368_v40 = vld [vmem:[%s1528_s30 + $0x14] sm:$0xf0] }
  0x16   : > { %v1256_v41 = vld [vmem:[%s1528_s30 + $0x90] sm:$0xf]  ;;  %v1384_v42 = vld [vmem:[%s1528_s30 + $0x94] sm:$0xf0]  ;;  %v1277_v43 = vor.u32 %v1387_v36, %v1274_v37  ;;  %v1193_v44 = vor.u32 %v1368_v40, %v1192_v39  ;;  %v1371_v46 = vld [vmem:[%s1528_s30 + $0x34] sm:$0xf] }
  0x17   : > { %741 = vmatpush.bf16.msra.mxu1 %v1405_v10  ;;  %1415 = vmatpush.bf16.msra.mxu3 %v1405_v10  ;;  %v1257_v45 = vor.u32 %v1384_v42, %v1256_v41  ;;  %v1210_v47 = vld [vmem:[%s1528_s30 + $0x38] sm:$0xf0]  ;;  %v1389_v48 = vld [vmem:[%s1528_s30 + $0xc4] sm:$0xf]  ;;  %v1282_v49 = vld [vmem:[%s1528_s30 + $0xc8] sm:$0xf0] }
  0x18   : > { %v1213_v50 = vor.u32 %v1371_v46, %v1210_v47  ;;  %v1200_v51 = vld [vmem:[%s1528_s30 + $0x20] sm:$0xf]  ;;  %v1370_v52 = vld [vmem:[%s1528_s30 + $0x24] sm:$0xf0]  ;;  %v1285_v55 = vor.u32 %v1389_v48, %v1282_v49  ;;  %v1373_v58 = vld [vmem:[%s1528_s30 + $0x44] sm:$0xf] }
  0x19   : > { %648 = vmatpush.bf16.msra.mxu0 %v1401_v14  ;;  %1409 = vmatpush.bf16.msra.mxu2 %v1401_v14  ;;  %v1264_v53 = vld [vmem:[%s1528_s30 + $0xa0] sm:$0xf]  ;;  %v1386_v54 = vld [vmem:[%s1528_s30 + $0xa4] sm:$0xf0]  ;;  %v1201_v56 = vor.u32 %v1370_v52, %v1200_v51  ;;  %v1218_v59 = vld [vmem:[%s1528_s30 + $0x48] sm:$0xf0] }
  0x1a   : > { %1346 = vmatmul.msk.bf16.vlgmr.msra.gmra.mxu1 %vm589_vm2, %v1189_v13  ;;  %1355 = vmatmul.msk.bf16.vlgmr.msra.gmra.mxu3 %vm589_vm2, %v1261_v17  ;;  %v1265_v57 = vor.u32 %v1386_v54, %v1264_v53  ;;  %v1391_v60 = vld [vmem:[%s1528_s30 + $0xd4] sm:$0xf]  ;;  %v1290_v61 = vld [vmem:[%s1528_s30 + $0xd8] sm:$0xf0]  ;;  %v1221_v62 = vor.u32 %v1373_v58, %v1218_v59  ;;  %v1208_v63 = vld [vmem:[%s1528_s30 + $0x30] sm:$0xf] }
  0x1b   : > { %v1372_v0 = vld [vmem:[%s1528_s30 + $0x34] sm:$0xf0]  ;;  %v1272_v1 = vld [vmem:[%s1528_s30 + $0xb0] sm:$0xf]  ;;  %v1293_v3 = vor.u32 %v1391_v60, %v1290_v61  ;;  %v1375_v6 = vld [vmem:[%s1528_s30 + $0x54] sm:$0xf] }
  0x1c   : > { %v1388_v2 = vld [vmem:[%s1528_s30 + $0xb4] sm:$0xf0]  ;;  %v1209_v4 = vor.u32 %v1372_v0, %v1208_v63  ;;  %v1226_v7 = vld [vmem:[%s1528_s30 + $0x58] sm:$0xf0]  ;;  %v1393_v8 = vld [vmem:[%s1528_s30 + $0xe4] sm:$0xf] }
  0x1d   : > { %649 = vmatpush.bf16.msra.mxu0 %v1400_v18  ;;  %1410 = vmatpush.bf16.msra.mxu2 %v1400_v18  ;;  %v1273_v5 = vor.u32 %v1388_v2, %v1272_v1  ;;  %v1298_v9 = vld [vmem:[%s1528_s30 + $0xe8] sm:$0xf0]  ;;  %v1229_v10 = vor.u32 %v1375_v6, %v1226_v7  ;;  %v1216_v11 = vld [vmem:[%s1528_s30 + $0x40] sm:$0xf]  ;;  %v1374_v12 = vld [vmem:[%s1528_s30 + $0x44] sm:$0xf0] }
  0x1e   : > { %v1280_v13 = vld [vmem:[%s1528_s30 + $0xc0] sm:$0xf]  ;;  %v1390_v14 = vld [vmem:[%s1528_s30 + $0xc4] sm:$0xf0]  ;;  %v1301_v15 = vor.u32 %v1393_v8, %v1298_v9  ;;  %v1217_v16 = vor.u32 %v1374_v12, %v1216_v11  ;;  %v1377_v18 = vld [vmem:[%s1528_s30 + $0x64] sm:$0xf] }
  0x1f   : > { %v1281_v17 = vor.u32 %v1390_v14, %v1280_v13  ;;  %v1306_v21 = vld [vmem:[%s1528_s30 + $0xf8] sm:$0xf0]  ;;  %v1224_v23 = vld [vmem:[%s1528_s30 + $0x50] sm:$0xf]  ;;  %v1376_v24 = vld [vmem:[%s1528_s30 + $0x54] sm:$0xf0] }
  0x20   : > { %v1225_v28 = vor.u32 %v1376_v24, %v1224_v23  ;;  %v1379_v30 = vld [vmem:[%s1528_s30 + $0x74] sm:$0xf]  ;;  %v1378_v34 = vld [vmem:[%s1528_s30 + $0x64] sm:$0xf0]  ;;  %v1468_v35 = vmov 0.0  }
  0x21   : > { %650 = vmatpush.bf16.msra.mxu0 %v1399_v19  ;;  %1411 = vmatpush.bf16.msra.mxu2 %v1399_v19  ;;  %v1234_v19 = vld [vmem:[%s1528_s30 + $0x68] sm:$0xf0]  ;;  %273 = vst.msk [vmem:[#allocation2] sm:$0xff] %vm272_vm3, %v1468_v35  ;;  %v1296_v36 = vld [vmem:[%s1528_s30 + $0xe0] sm:$0xf] }
  0x22   : > { %v1237_v22 = vor.u32 %v1377_v18, %v1234_v19  ;;  %v1394_v37 = vld [vmem:[%s1528_s30 + $0xe4] sm:$0xf0]  ;;  %274 = vst.msk [vmem:[#allocation2 + $0x8] sm:$0xff] %vm272_vm3, %v1468_v35  ;;  %v1381_v40 = vld [vmem:[%s1528_s30 + $0x84] sm:$0xf] }
  0x23   : > { %275 = vst.msk [vmem:[#allocation2 + $0x10] sm:$0xff] %vm272_vm3, %v1468_v35  ;;  %v1297_v39 = vor.u32 %v1394_v37, %v1296_v36  ;;  %v1250_v41 = vld [vmem:[%s1528_s30 + $0x88] sm:$0xf0]  ;;  %v1304_v46 = vld [vmem:[%s1528_s30 + $0xf0] sm:$0xf] }
  0x24   : > { %276 = vst.msk [vmem:[#allocation2 + $0x18] sm:$0xff] %vm272_vm3, %v1468_v35  ;;  %v1253_v42 = vor.u32 %v1381_v40, %v1250_v41  ;;  %v1396_v47 = vld [vmem:[%s1528_s30 + $0xf4] sm:$0xf0] }
  0x25   : > { %651 = vmatpush.bf16.msra.mxu0 %v1398_v20  ;;  %1412 = vmatpush.bf16.msra.mxu2 %v1398_v20  ;;  %v1395_v20 = vld [vmem:[%s1528_s30 + $0xf4] sm:$0xf]  ;;  %277 = vst.msk [vmem:[#allocation2 + $0x20] sm:$0xff] %vm272_vm3, %v1468_v35  ;;  %v1305_v49 = vor.u32 %v1396_v47, %v1304_v46 }
  0x26   : > { %v1309_v27 = vor.u32 %v1395_v20, %v1306_v21  ;;  %278 = vst.msk [vmem:[#allocation2 + $0x28] sm:$0xff] %vm272_vm3, %v1468_v35 }
  0x27   : > { %279 = vst.msk [vmem:[#allocation2 + $0x30] sm:$0xff] %vm272_vm3, %v1468_v35 }
  0x28   : > { %280 = vst.msk [vmem:[#allocation2 + $0x38] sm:$0xff] %vm272_vm3, %v1468_v35  ;;  %v305_v53 = vld [vmem:[#allocation2] sm:$0xff] }
  0x29   : > { %652 = vmatpush.bf16.msra.mxu0 %v1397_v26  ;;  %1413 = vmatpush.bf16.msra.mxu2 %v1397_v26  ;;  %v1392_v26 = vld [vmem:[%s1528_s30 + $0xd4] sm:$0xf0]  ;;  %281 = vst.msk [vmem:[#allocation2 + $0x40] sm:$0xff] %vm272_vm3, %v1468_v35  ;;  %v306_v60 = vld [vmem:[#allocation2 + $0x8] sm:$0xff] }
  0x2a   : > { %1347 = vmatmul.msk.bf16.gmra.mxu1 %vm589_vm2, %v1197_v25  ;;  %1356 = vmatmul.msk.bf16.gmra.mxu3 %vm589_vm2, %v1269_v31  ;;  %v1288_v25 = vld [vmem:[%s1528_s30 + $0xd0] sm:$0xf]  ;;  %v1242_v31 = vld [vmem:[%s1528_s30 + $0x78] sm:$0xf0]  ;;  %282 = vst.msk [vmem:[#allocation2 + $0x48] sm:$0xff] %vm272_vm3, %v1468_v35 }
  0x2b   : > { %v1289_v29 = vor.u32 %v1392_v26, %v1288_v25  ;;  %283 = vst.msk [vmem:[#allocation2 + $0x50] sm:$0xff] %vm272_vm3, %v1468_v35  ;;  %v307_v6 = vld [vmem:[#allocation2 + $0x10] sm:$0xff]  ;;  %v308_v19 = vld [vmem:[#allocation2 + $0x18] sm:$0xff] }
  0x2c   : > { %653 = vmatmul.bf16.vlgmr.msra.gmra.mxu0 %v1185_v32  ;;  %693 = vmatmul.bf16.vlgmr.msra.gmra.mxu2 %v1249_v33  ;;  %v1245_v32 = vor.u32 %v1379_v30, %v1242_v31  ;;  %v1232_v33 = vld [vmem:[%s1528_s30 + $0x60] sm:$0xf]  ;;  %284 = vst.msk [vmem:[#allocation2 + $0x58] sm:$0xff] %vm272_vm3, %v1468_v35 }
  0x2d   : > { %285 = vst.msk [vmem:[#allocation2 + $0x60] sm:$0xff] %vm272_vm3, %v1468_v35 }
  0x2e   : > { %286 = vst.msk [vmem:[#allocation2 + $0x68] sm:$0xff] %vm272_vm3, %v1468_v35 }
  0x2f   : > { %287 = vst.msk [vmem:[#allocation2 + $0x70] sm:$0xff] %vm272_vm3, %v1468_v35 }
  0x30   : > { %288 = vst.msk [vmem:[#allocation2 + $0x78] sm:$0xff] %vm272_vm3, %v1468_v35 }
  0x31   : > { %289 = vst.msk [vmem:[#allocation2 + $0x80] sm:$0xff] %vm272_vm3, %v1468_v35 }
  0x32   : > { %290 = vst.msk [vmem:[#allocation2 + $0x88] sm:$0xff] %vm272_vm3, %v1468_v35 }
  0x33   : > { %291 = vst.msk [vmem:[#allocation2 + $0x90] sm:$0xff] %vm272_vm3, %v1468_v35 }
  0x34   : > { %292 = vst.msk [vmem:[#allocation2 + $0x98] sm:$0xff] %vm272_vm3, %v1468_v35 }
  0x35   : > { %293 = vst.msk [vmem:[#allocation2 + $0xa0] sm:$0xff] %vm272_vm3, %v1468_v35 }
  0x36   : > { %294 = vst.msk [vmem:[#allocation2 + $0xa8] sm:$0xff] %vm272_vm3, %v1468_v35 }
  0x37   : > { %295 = vst.msk [vmem:[#allocation2 + $0xb0] sm:$0xff] %vm272_vm3, %v1468_v35 }
  0x38   : > { %296 = vst.msk [vmem:[#allocation2 + $0xb8] sm:$0xff] %vm272_vm3, %v1468_v35 }
  0x39   : > { %297 = vst.msk [vmem:[#allocation2 + $0xc0] sm:$0xff] %vm272_vm3, %v1468_v35 }
  0x3a   : > { %1348 = vmatmul.msk.bf16.gmra.mxu1 %vm589_vm2, %v1205_v38  ;;  %1357 = vmatmul.msk.bf16.gmra.mxu3 %vm589_vm2, %v1277_v43  ;;  %v1233_v38 = vor.u32 %v1378_v34, %v1232_v33  ;;  %v1240_v43 = vld [vmem:[%s1528_s30 + $0x70] sm:$0xf]  ;;  %298 = vst.msk [vmem:[#allocation2 + $0xc8] sm:$0xff] %vm272_vm3, %v1468_v35  ;;  %v309_v33 = vld [vmem:[#allocation2 + $0x20] sm:$0xff] }
  0x3b   : > { %299 = vst.msk [vmem:[#allocation2 + $0xd0] sm:$0xff] %vm272_vm3, %v1468_v35  ;;  %v324_v30 = vld [vmem:[#allocation2 + $0x98] sm:$0xff] }
  0x3c   : > { %658 = vmatmul.bf16.gmra.mxu0 %v1193_v44  ;;  %698 = vmatmul.bf16.gmra.mxu2 %v1257_v45  ;;  %v1380_v44 = vld [vmem:[%s1528_s30 + $0x74] sm:$0xf0]  ;;  %300 = vst.msk [vmem:[#allocation2 + $0xd8] sm:$0xff] %vm272_vm3, %v1468_v35  ;;  %v325_v47 = vld [vmem:[#allocation2 + $0xa0] sm:$0xff] }
  0x3d   : > { %v1241_v48 = vor.u32 %v1380_v44, %v1240_v43  ;;  %301 = vst.msk [vmem:[#allocation2 + $0xe0] sm:$0xff] %vm272_vm3, %v1468_v35 }
  0x3e   : > { %302 = vst.msk [vmem:[#allocation2 + $0xe8] sm:$0xff] %vm272_vm3, %v1468_v35 }
  0x3f   : > { %303 = vst.msk [vmem:[#allocation2 + $0xf0] sm:$0xff] %vm272_vm3, %v1468_v35 }
  0x40   : > { %304 = vst.msk [vmem:[#allocation2 + $0xf8] sm:$0xff] %vm272_vm3, %v1468_v35 }
  0x4a   : > { %1349 = vmatmul.msk.bf16.gmra.mxu1 %vm589_vm2, %v1213_v50  ;;  %1358 = vmatmul.msk.bf16.gmra.mxu3 %vm589_vm2, %v1285_v55 }
  0x4c   : > { %663 = vmatmul.bf16.gmra.mxu0 %v1201_v56  ;;  %703 = vmatmul.bf16.gmra.mxu2 %v1265_v57 }
  0x5a   : > { %1350 = vmatmul.msk.bf16.gmra.mxu1 %vm589_vm2, %v1221_v62  ;;  %1359 = vmatmul.msk.bf16.gmra.mxu3 %vm589_vm2, %v1293_v3  ;;  %v1663_v62 = vld [vmem:[%s1813_s2] ss:$0 sm:$0xff] }
  0x5c   : > { %668 = vmatmul.bf16.gmra.mxu0 %v1209_v4  ;;  %708 = vmatmul.bf16.gmra.mxu2 %v1273_v5 }
  0x6a   : > { %1351 = vmatmul.msk.bf16.gmra.mxu1 %vm589_vm2, %v1229_v10  ;;  %1360 = vmatmul.msk.bf16.gmra.mxu3 %vm589_vm2, %v1301_v15 }
  0x6c   : > { %673 = vmatmul.bf16.gmra.mxu0 %v1217_v16  ;;  %713 = vmatmul.bf16.gmra.mxu2 %v1281_v17  ;;  %v323_v16 = vld [vmem:[#allocation2 + $0x90] sm:$0xff] }
  0x7a   : > { %1352 = vmatmul.msk.bf16.gmra.mxu1 %vm589_vm2, %v1237_v22  ;;  %1361 = vmatmul.msk.bf16.gmra.mxu3 %vm589_vm2, %v1309_v27 }
  0x7c   : > { %678 = vmatmul.bf16.gmra.mxu0 %v1225_v28  ;;  %718 = vmatmul.bf16.gmra.mxu2 %v1289_v29 }
  0x8a   : > { %1353 = vmatmul.msk.bf16.gmra.mxu1 %vm589_vm2, %v1245_v32 }
  0x8c   : > { %683 = vmatmul.bf16.gmra.mxu0 %v1233_v38  ;;  %723 = vmatmul.bf16.gmra.mxu2 %v1297_v39 }
  0x97   : > { %v743_v45 = vpop.f32.mrf.mxu1 }
  0x9a   : > { %1354 = vmatmul.msk.bf16.gmra.mxu1 %vm589_vm2, %v1253_v42 }
  0x9c   : > { %688 = vmatmul.bf16.gmra.mxu0 %v1241_v48  ;;  %728 = vmatmul.bf16.gmra.mxu2 %v1305_v49 }
  0x9d   : > { %v788_v52 = vpop.f32.mrf.mxu3 }
  0x9f   : > { %v745_v50 = vpop.f32.mrf.mxu1 }
  0xa5   : > { %v790_v59 = vpop.f32.mrf.mxu3 }
  0xa7   : > { %v748_v51 = vpop.f32.mrf.mxu1 }
  0xa9   : > { %v654_v54 = vpop.f32.mrf.mxu0 }
  0xaa   : > { %v744_v55 = vadd.f32 %v743_v45, %v654_v54 }
  0xac   : > { %v823_v56 = vadd.f32 %v744_v55, %v305_v53 }
  0xad   : > { %v793_v10 = vpop.f32.mrf.mxu3 }
  0xae   : > { %856 = vst.msk [vmem:[#allocation2] sm:$0xff] %vm272_vm3, %v823_v56 }
  0xaf   : > { %v750_v57 = vpop.f32.mrf.mxu1  ;;  %v1658_v58 = vpop.f32.mrf.mxu2 }
  0xb1   : > { %v656_v61 = vpop.f32.mrf.mxu0 }
  0xb2   : > { %v746_v63 = vadd.f32 %v745_v50, %v656_v61 }
  0xb4   : > { %v824_v0 = vadd.f32 %v746_v63, %v306_v60 }
  0xb5   : > { %v891_v1 = vld [vmem:[#allocation2] sm:$0xff]  ;;  %v795_v25 = vpop.f32.mrf.mxu3 }
  0xb6   : > { %v927_v2 = vadd.f32 %v1663_v62, %v891_v1  ;;  %857 = vst.msk [vmem:[#allocation2 + $0x8] sm:$0xff] %vm272_vm3, %v824_v0 }
  0xb7   : > { %v753_v3 = vpop.f32.mrf.mxu1  ;;  %v1668_v5 = vpop.f32.mrf.mxu2 }
  0xb8   : > { %v959_v4 = vmax.f32 %v927_v2, 0.0  ;;  %v326_v2 = vld [vmem:[#allocation2 + $0xa8] sm:$0xff] }
  0xb9   : > { %v659_v7 = vpop.f32.mrf.mxu0 }
  0xba   : > { %v991_v8 = vpack.c.bf16 %v959_v4, %v959_v4  ;;  %v749_v9 = vadd.f32 %v748_v51, %v659_v7  ;;  %v310_v51 = vld [vmem:[#allocation2 + $0x28] sm:$0xff] }
  0xbc   : > { %1024 = vst.msk [vmem:[%s1673_s23] sm:$0xf] %vm1023_vm4, %v991_v8  ;;  %v825_v11 = vadd.f32 %v749_v9, %v307_v6  ;;  %v311_v8 = vld [vmem:[#allocation2 + $0x30] sm:$0xff] }
  0xbd   : > { %v892_v12 = vld [vmem:[#allocation2 + $0x8] sm:$0xff]  ;;  %v798_v44 = vpop.f32.mrf.mxu3 }
  0xbe   : > { %v928_v13 = vadd.f32 %v1663_v62, %v892_v12  ;;  %858 = vst.msk [vmem:[#allocation2 + $0x10] sm:$0xff] %vm272_vm3, %v825_v11 }
  0xbf   : > { %v755_v14 = vpop.f32.mrf.mxu1  ;;  %v699_v17 = vpop.f32.mrf.mxu2 }
  0xc0   : > { %v960_v15 = vmax.f32 %v928_v13, 0.0  ;;  %v789_v18 = vadd.f32 %v788_v52, %v699_v17 }
  0xc1   : > { %v661_v20 = vpop.f32.mrf.mxu0 }
  0xc2   : > { %v992_v21 = vpack.c.bf16 %v960_v15, %v960_v15  ;;  %v751_v22 = vadd.f32 %v750_v57, %v661_v20  ;;  %v841_v23 = vadd.f32 %v789_v18, %v323_v16 }
  0xc4   : > { %1025 = vst.msk [vmem:[%s1673_s23 + $0x4] sm:$0xf] %vm1023_vm4, %v992_v21  ;;  %v826_v24 = vadd.f32 %v751_v22, %v308_v19  ;;  %v327_v21 = vld [vmem:[#allocation2 + $0xb0] sm:$0xff] }
  0xc5   : > { %v893_v26 = vld [vmem:[#allocation2 + $0x10] sm:$0xff]  ;;  %874 = vst.msk [vmem:[#allocation2 + $0x90] sm:$0xff] %vm272_vm3, %v841_v23  ;;  %v800_v4 = vpop.f32.mrf.mxu3 }
  0xc6   : > { %v929_v27 = vadd.f32 %v1663_v62, %v893_v26  ;;  %859 = vst.msk [vmem:[#allocation2 + $0x18] sm:$0xff] %vm272_vm3, %v826_v24 }
  0xc7   : > { %v758_v28 = vpop.f32.mrf.mxu1  ;;  %v701_v31 = vpop.f32.mrf.mxu2 }
  0xc8   : > { %v961_v29 = vmax.f32 %v929_v27, 0.0  ;;  %v791_v32 = vadd.f32 %v790_v59, %v701_v31 }
  0xc9   : > { %v664_v34 = vpop.f32.mrf.mxu0 }
  0xca   : > { %v993_v35 = vpack.c.bf16 %v961_v29, %v961_v29  ;;  %v754_v36 = vadd.f32 %v753_v3, %v664_v34  ;;  %v842_v37 = vadd.f32 %v791_v32, %v324_v30 }
  0xcc   : > { %1026 = vst.msk [vmem:[%s1673_s23 + $0x8] sm:$0xf] %vm1023_vm4, %v993_v35  ;;  %v909_v38 = vld [vmem:[#allocation2 + $0x90] sm:$0xff]  ;;  %v827_v39 = vadd.f32 %v754_v36, %v309_v33 }
  0xcd   : > { %v945_v40 = vadd.f32 %v1663_v62, %v909_v38  ;;  %v894_v41 = vld [vmem:[#allocation2 + $0x18] sm:$0xff]  ;;  %875 = vst.msk [vmem:[#allocation2 + $0x98] sm:$0xff] %vm272_vm3, %v842_v37  ;;  %v803_v29 = vpop.f32.mrf.mxu3 }
  0xce   : > { %v930_v42 = vadd.f32 %v1663_v62, %v894_v41  ;;  %860 = vst.msk [vmem:[#allocation2 + $0x20] sm:$0xff] %vm272_vm3, %v827_v39  ;;  %v328_v39 = vld [vmem:[#allocation2 + $0xb8] sm:$0xff] }
  0xcf   : > { %v760_v43 = vpop.f32.mrf.mxu1  ;;  %v977_v45 = vmax.f32 %v945_v40, 0.0  ;;  %v704_v48 = vpop.f32.mrf.mxu2 }
  0xd0   : > { %v962_v46 = vmax.f32 %v930_v42, 0.0  ;;  %v794_v50 = vadd.f32 %v793_v10, %v704_v48 }
  0xd1   : > { %v1009_v49 = vpack.c.bf16 %v977_v45, %v977_v45  ;;  %v666_v52 = vpop.f32.mrf.mxu0 }
  0xd2   : > { %v994_v53 = vpack.c.bf16 %v962_v46, %v962_v46  ;;  %v756_v54 = vadd.f32 %v755_v14, %v666_v52  ;;  %v843_v55 = vadd.f32 %v794_v50, %v325_v47 }
  0xd3   : > { %1042 = vst.msk [vmem:[%s1673_s23 + $0x48] sm:$0xf] %vm1023_vm4, %v1009_v49 }
  0xd4   : > { %1027 = vst.msk [vmem:[%s1673_s23 + $0xc] sm:$0xf] %vm1023_vm4, %v994_v53  ;;  %v910_v56 = vld [vmem:[#allocation2 + $0x98] sm:$0xff]  ;;  %v828_v57 = vadd.f32 %v756_v54, %v310_v51 }
  0xd5   : > { %v946_v59 = vadd.f32 %v1663_v62, %v910_v56  ;;  %v895_v60 = vld [vmem:[#allocation2 + $0x20] sm:$0xff]  ;;  %876 = vst.msk [vmem:[#allocation2 + $0xa0] sm:$0xff] %vm272_vm3, %v843_v55  ;;  %v805_v50 = vpop.f32.mrf.mxu3 }
  0xd6   : > { %v931_v61 = vadd.f32 %v1663_v62, %v895_v60  ;;  %861 = vst.msk [vmem:[#allocation2 + $0x28] sm:$0xff] %vm272_vm3, %v828_v57  ;;  %v329_v57 = vld [vmem:[#allocation2 + $0xc0] sm:$0xff] }
  0xd7   : > { %v763_v63 = vpop.f32.mrf.mxu1  ;;  %v978_v0 = vmax.f32 %v946_v59, 0.0  ;;  %v706_v3 = vpop.f32.mrf.mxu2 }
  0xd8   : > { %v963_v1 = vmax.f32 %v931_v61, 0.0  ;;  %v796_v7 = vadd.f32 %v795_v25, %v706_v3  ;;  %v312_v25 = vld [vmem:[#allocation2 + $0x38] sm:$0xff] }
  0xd9   : > { %v1010_v6 = vpack.c.bf16 %v978_v0, %v978_v0  ;;  %v669_v9 = vpop.f32.mrf.mxu0 }
  0xda   : > { %v995_v10 = vpack.c.bf16 %v963_v1, %v963_v1  ;;  %v759_v11 = vadd.f32 %v758_v28, %v669_v9  ;;  %v844_v12 = vadd.f32 %v796_v7, %v326_v2 }
  0xdb   : > { %1043 = vst.msk [vmem:[%s1673_s23 + $0x4c] sm:$0xf] %vm1023_vm4, %v1010_v6 }
  0xdc   : > { %1028 = vst.msk [vmem:[%s1673_s23 + $0x10] sm:$0xf] %vm1023_vm4, %v995_v10  ;;  %v911_v13 = vld [vmem:[#allocation2 + $0xa0] sm:$0xff]  ;;  %v829_v14 = vadd.f32 %v759_v11, %v311_v8 }
  0xdd   : > { %v947_v15 = vadd.f32 %v1663_v62, %v911_v13  ;;  %v896_v16 = vld [vmem:[#allocation2 + $0x28] sm:$0xff]  ;;  %877 = vst.msk [vmem:[#allocation2 + $0xa8] sm:$0xff] %vm272_vm3, %v844_v12  ;;  %v808_v11 = vpop.f32.mrf.mxu3 }
  0xde   : > { %v932_v17 = vadd.f32 %v1663_v62, %v896_v16  ;;  %862 = vst.msk [vmem:[#allocation2 + $0x30] sm:$0xff] %vm272_vm3, %v829_v14  ;;  %v330_v14 = vld [vmem:[#allocation2 + $0xc8] sm:$0xff] }
  0xdf   : > { %v765_v18 = vpop.f32.mrf.mxu1  ;;  %v979_v19 = vmax.f32 %v947_v15, 0.0  ;;  %v709_v22 = vpop.f32.mrf.mxu2 }
  0xe0   : > { %v964_v20 = vmax.f32 %v932_v17, 0.0  ;;  %v799_v24 = vadd.f32 %v798_v44, %v709_v22 }
  0xe1   : > { %v1011_v23 = vpack.c.bf16 %v979_v19, %v979_v19  ;;  %v671_v26 = vpop.f32.mrf.mxu0 }
  0xe2   : > { %v996_v27 = vpack.c.bf16 %v964_v20, %v964_v20  ;;  %v761_v28 = vadd.f32 %v760_v43, %v671_v26  ;;  %v845_v30 = vadd.f32 %v799_v24, %v327_v21  ;;  %v313_v43 = vld [vmem:[#allocation2 + $0x40] sm:$0xff] }
  0xe3   : > { %1044 = vst.msk [vmem:[%s1673_s23 + $0x50] sm:$0xf] %vm1023_vm4, %v1011_v23 }
  0xe4   : > { %1029 = vst.msk [vmem:[%s1673_s23 + $0x14] sm:$0xf] %vm1023_vm4, %v996_v27  ;;  %v912_v31 = vld [vmem:[#allocation2 + $0xa8] sm:$0xff]  ;;  %v830_v32 = vadd.f32 %v761_v28, %v312_v25 }
  0xe5   : > { %v948_v33 = vadd.f32 %v1663_v62, %v912_v31  ;;  %v897_v34 = vld [vmem:[#allocation2 + $0x30] sm:$0xff]  ;;  %878 = vst.msk [vmem:[#allocation2 + $0xb0] sm:$0xff] %vm272_vm3, %v845_v30 }
  0xe6   : > { %v933_v35 = vadd.f32 %v1663_v62, %v897_v34  ;;  %863 = vst.msk [vmem:[#allocation2 + $0x38] sm:$0xff] %vm272_vm3, %v830_v32  ;;  %v331_v31 = vld [vmem:[#allocation2 + $0xd0] sm:$0xff] }
  0xe7   : > { %v768_v36 = vpop.f32.mrf.mxu1  ;;  %v980_v37 = vmax.f32 %v948_v33, 0.0  ;;  %v711_v40 = vpop.f32.mrf.mxu2 }
  0xe8   : > { %v965_v38 = vmax.f32 %v933_v35, 0.0  ;;  %v801_v42 = vadd.f32 %v800_v4, %v711_v40  ;;  %v810_v33 = vpop.f32.mrf.mxu3 }
  0xe9   : > { %v1012_v41 = vpack.c.bf16 %v980_v37, %v980_v37  ;;  %v674_v44 = vpop.f32.mrf.mxu0 }
  0xea   : > { %v997_v45 = vpack.c.bf16 %v965_v38, %v965_v38  ;;  %v764_v46 = vadd.f32 %v763_v63, %v674_v44  ;;  %v846_v47 = vadd.f32 %v801_v42, %v328_v39  ;;  %v314_v63 = vld [vmem:[#allocation2 + $0x48] sm:$0xff] }
  0xeb   : > { %1045 = vst.msk [vmem:[%s1673_s23 + $0x54] sm:$0xf] %vm1023_vm4, %v1012_v41 }
  0xec   : > { %1030 = vst.msk [vmem:[%s1673_s23 + $0x18] sm:$0xf] %vm1023_vm4, %v997_v45  ;;  %v913_v48 = vld [vmem:[#allocation2 + $0xb0] sm:$0xff]  ;;  %v831_v49 = vadd.f32 %v764_v46, %v313_v43 }
  0xed   : > { %v949_v51 = vadd.f32 %v1663_v62, %v913_v48  ;;  %v898_v52 = vld [vmem:[#allocation2 + $0x38] sm:$0xff]  ;;  %879 = vst.msk [vmem:[#allocation2 + $0xb8] sm:$0xff] %vm272_vm3, %v846_v47 }
  0xee   : > { %v934_v53 = vadd.f32 %v1663_v62, %v898_v52  ;;  %864 = vst.msk [vmem:[#allocation2 + $0x40] sm:$0xff] %vm272_vm3, %v831_v49  ;;  %v332_v49 = vld [vmem:[#allocation2 + $0xd8] sm:$0xff] }
  0xef   : > { %v770_v54 = vpop.f32.mrf.mxu1  ;;  %v981_v55 = vmax.f32 %v949_v51, 0.0  ;;  %v714_v59 = vpop.f32.mrf.mxu2 }
  0xf0   : > { %v966_v56 = vmax.f32 %v934_v53, 0.0  ;;  %v804_v61 = vadd.f32 %v803_v29, %v714_v59  ;;  %v317_v53 = vld [vmem:[#allocation2 + $0x60] sm:$0xff] }
  0xf1   : > { %v1013_v60 = vpack.c.bf16 %v981_v55, %v981_v55  ;;  %v676_v0 = vpop.f32.mrf.mxu0 }
  0xf2   : > { %v998_v1 = vpack.c.bf16 %v966_v56, %v966_v56  ;;  %v766_v2 = vadd.f32 %v765_v18, %v676_v0  ;;  %v847_v3 = vadd.f32 %v804_v61, %v329_v57  ;;  %v315_v18 = vld [vmem:[#allocation2 + $0x50] sm:$0xff]  ;;  %v813_v56 = vpop.f32.mrf.mxu3 }
  0xf3   : > { %1046 = vst.msk [vmem:[%s1673_s23 + $0x58] sm:$0xf] %vm1023_vm4, %v1013_v60 }
  0xf4   : > { %1031 = vst.msk [vmem:[%s1673_s23 + $0x1c] sm:$0xf] %vm1023_vm4, %v998_v1  ;;  %v914_v4 = vld [vmem:[#allocation2 + $0xb8] sm:$0xff]  ;;  %v832_v6 = vadd.f32 %v766_v2, %v314_v63 }
  0xf5   : > { %v950_v7 = vadd.f32 %v1663_v62, %v914_v4  ;;  %v899_v8 = vld [vmem:[#allocation2 + $0x40] sm:$0xff]  ;;  %880 = vst.msk [vmem:[#allocation2 + $0xc0] sm:$0xff] %vm272_vm3, %v847_v3 }
  0xf6   : > { %v935_v9 = vadd.f32 %v1663_v62, %v899_v8  ;;  %865 = vst.msk [vmem:[#allocation2 + $0x48] sm:$0xff] %vm272_vm3, %v832_v6  ;;  %v333_v6 = vld [vmem:[#allocation2 + $0xe0] sm:$0xff] }
  0xf7   : > { %v773_v10 = vpop.f32.mrf.mxu1  ;;  %v982_v12 = vmax.f32 %v950_v7, 0.0  ;;  %v716_v15 = vpop.f32.mrf.mxu2 }
  0xf8   : > { %v967_v13 = vmax.f32 %v935_v9, 0.0  ;;  %v806_v17 = vadd.f32 %v805_v50, %v716_v15 }
  0xf9   : > { %v1014_v16 = vpack.c.bf16 %v982_v12, %v982_v12  ;;  %v679_v19 = vpop.f32.mrf.mxu0 }
  0xfa   : > { %v999_v20 = vpack.c.bf16 %v967_v13, %v967_v13  ;;  %v769_v21 = vadd.f32 %v768_v36, %v679_v19  ;;  %v848_v22 = vadd.f32 %v806_v17, %v330_v14  ;;  %v316_v36 = vld [vmem:[#allocation2 + $0x58] sm:$0xff] }
  0xfb   : > { %1047 = vst.msk [vmem:[%s1673_s23 + $0x5c] sm:$0xf] %vm1023_vm4, %v1014_v16  ;;  %v815_v16 = vpop.f32.mrf.mxu3 }
  0xfc   : > { %1032 = vst.msk [vmem:[%s1673_s23 + $0x20] sm:$0xf] %vm1023_vm4, %v999_v20  ;;  %v915_v23 = vld [vmem:[#allocation2 + $0xc0] sm:$0xff]  ;;  %v833_v24 = vadd.f32 %v769_v21, %v315_v18 }
  0xfd   : > { %v951_v25 = vadd.f32 %v1663_v62, %v915_v23  ;;  %v900_v26 = vld [vmem:[#allocation2 + $0x48] sm:$0xff]  ;;  %881 = vst.msk [vmem:[#allocation2 + $0xc8] sm:$0xff] %vm272_vm3, %v848_v22  ;;  %v321_v21 = vld [vmem:[#allocation2 + $0x80] sm:$0xff] }
  0xfe   : > { %v936_v27 = vadd.f32 %v1663_v62, %v900_v26  ;;  %866 = vst.msk [vmem:[#allocation2 + $0x50] sm:$0xff] %vm272_vm3, %v833_v24  ;;  %v334_v26 = vld [vmem:[#allocation2 + $0xe8] sm:$0xff] }
  0xff   : > { %v775_v28 = vpop.f32.mrf.mxu1  ;;  %v983_v29 = vmax.f32 %v951_v25, 0.0  ;;  %v719_v32 = vpop.f32.mrf.mxu2 }
 0x100   : > { %v968_v30 = vmax.f32 %v936_v27, 0.0  ;;  %v809_v35 = vadd.f32 %v808_v11, %v719_v32 }
 0x101   : > { %v1015_v34 = vpack.c.bf16 %v983_v29, %v983_v29  ;;  %v681_v37 = vpop.f32.mrf.mxu0 }
 0x102   : > { %v1000_v38 = vpack.c.bf16 %v968_v30, %v968_v30  ;;  %v771_v39 = vadd.f32 %v770_v54, %v681_v37  ;;  %v849_v40 = vadd.f32 %v809_v35, %v331_v31  ;;  %v319_v31 = vld [vmem:[#allocation2 + $0x70] sm:$0xff] }
 0x103   : > { %1048 = vst.msk [vmem:[%s1673_s23 + $0x60] sm:$0xf] %vm1023_vm4, %v1015_v34 }
 0x104   : > { %1033 = vst.msk [vmem:[%s1673_s23 + $0x24] sm:$0xf] %vm1023_vm4, %v1000_v38  ;;  %v916_v41 = vld [vmem:[#allocation2 + $0xc8] sm:$0xff]  ;;  %v834_v42 = vadd.f32 %v771_v39, %v316_v36 }
 0x105   : > { %v952_v43 = vadd.f32 %v1663_v62, %v916_v41  ;;  %v901_v44 = vld [vmem:[#allocation2 + $0x50] sm:$0xff]  ;;  %882 = vst.msk [vmem:[#allocation2 + $0xd0] sm:$0xff] %vm272_vm3, %v849_v40  ;;  %v818_v40 = vpop.f32.mrf.mxu3  ;;  %v322_v41 = vld [vmem:[#allocation2 + $0x88] sm:$0xff] }
 0x106   : > { %v937_v45 = vadd.f32 %v1663_v62, %v901_v44  ;;  %867 = vst.msk [vmem:[#allocation2 + $0x58] sm:$0xff] %vm272_vm3, %v834_v42 }
 0x107   : > { %v778_v46 = vpop.f32.mrf.mxu1  ;;  %v984_v47 = vmax.f32 %v952_v43, 0.0  ;;  %v721_v50 = vpop.f32.mrf.mxu2 }
 0x108   : > { %v969_v48 = vmax.f32 %v937_v45, 0.0  ;;  %v811_v52 = vadd.f32 %v810_v33, %v721_v50 }
 0x109   : > { %v1016_v51 = vpack.c.bf16 %v984_v47, %v984_v47  ;;  %v684_v54 = vpop.f32.mrf.mxu0 }
 0x10a   : > { %v1001_v55 = vpack.c.bf16 %v969_v48, %v969_v48  ;;  %v774_v57 = vadd.f32 %v773_v10, %v684_v54  ;;  %v850_v59 = vadd.f32 %v811_v52, %v332_v49  ;;  %v318_v10 = vld [vmem:[#allocation2 + $0x68] sm:$0xff] }
 0x10b   : > { %1049 = vst.msk [vmem:[%s1673_s23 + $0x64] sm:$0xf] %vm1023_vm4, %v1016_v51  ;;  %v320_v51 = vld [vmem:[#allocation2 + $0x78] sm:$0xff] }
 0x10c   : > { %1034 = vst.msk [vmem:[%s1673_s23 + $0x28] sm:$0xf] %vm1023_vm4, %v1001_v55  ;;  %v917_v60 = vld [vmem:[#allocation2 + $0xd0] sm:$0xff]  ;;  %v835_v61 = vadd.f32 %v774_v57, %v317_v53 }
 0x10d   : > { %v953_v63 = vadd.f32 %v1663_v62, %v917_v60  ;;  %v902_v0 = vld [vmem:[#allocation2 + $0x58] sm:$0xff]  ;;  %883 = vst.msk [vmem:[#allocation2 + $0xd8] sm:$0xff] %vm272_vm3, %v850_v59 }
 0x10e   : > { %v938_v1 = vadd.f32 %v1663_v62, %v902_v0  ;;  %868 = vst.msk [vmem:[#allocation2 + $0x60] sm:$0xff] %vm272_vm3, %v835_v61 }
 0x10f   : > { %v780_v2 = vpop.f32.mrf.mxu1  ;;  %v985_v3 = vmax.f32 %v953_v63, 0.0  ;;  %v724_v7 = vpop.f32.mrf.mxu2 }
 0x110   : > { %v970_v4 = vmax.f32 %v938_v1, 0.0  ;;  %v814_v9 = vadd.f32 %v813_v56, %v724_v7 }
 0x111   : > { %v1017_v8 = vpack.c.bf16 %v985_v3, %v985_v3  ;;  %v686_v11 = vpop.f32.mrf.mxu0  ;;  %v336_v3 = vld [vmem:[#allocation2 + $0xf8] sm:$0xff] }
 0x112   : > { %v1002_v12 = vpack.c.bf16 %v970_v4, %v970_v4  ;;  %v776_v13 = vadd.f32 %v775_v28, %v686_v11  ;;  %v851_v14 = vadd.f32 %v814_v9, %v333_v6 }
 0x113   : > { %1050 = vst.msk [vmem:[%s1673_s23 + $0x68] sm:$0xf] %vm1023_vm4, %v1017_v8 }
 0x114   : > { %1035 = vst.msk [vmem:[%s1673_s23 + $0x2c] sm:$0xf] %vm1023_vm4, %v1002_v12  ;;  %v918_v15 = vld [vmem:[#allocation2 + $0xd8] sm:$0xff]  ;;  %v836_v17 = vadd.f32 %v776_v13, %v318_v10 }
 0x115   : > { %v954_v18 = vadd.f32 %v1663_v62, %v918_v15  ;;  %v903_v19 = vld [vmem:[#allocation2 + $0x60] sm:$0xff]  ;;  %884 = vst.msk [vmem:[#allocation2 + $0xe0] sm:$0xff] %vm272_vm3, %v851_v14 }
 0x116   : > { %v939_v20 = vadd.f32 %v1663_v62, %v903_v19  ;;  %869 = vst.msk [vmem:[#allocation2 + $0x68] sm:$0xff] %vm272_vm3, %v836_v17 }
 0x117   : > { %v783_v22 = vpop.f32.mrf.mxu1  ;;  %v986_v23 = vmax.f32 %v954_v18, 0.0  ;;  %v726_v27 = vpop.f32.mrf.mxu2 }
 0x118   : > { %v784_v24 = vadd.f32 %v783_v22, %v1658_v58  ;;  %v971_v25 = vmax.f32 %v939_v20, 0.0  ;;  %v816_v30 = vadd.f32 %v815_v16, %v726_v27 }
 0x119   : > { %v1018_v28 = vpack.c.bf16 %v986_v23, %v986_v23  ;;  %v689_v32 = vpop.f32.mrf.mxu0 }
 0x11a   : > { %v839_v29 = vadd.f32 %v784_v24, %v321_v21  ;;  %v1003_v33 = vpack.c.bf16 %v971_v25, %v971_v25  ;;  %v779_v34 = vadd.f32 %v778_v46, %v689_v32  ;;  %v852_v35 = vadd.f32 %v816_v30, %v334_v26  ;;  %v335_v46 = vld [vmem:[#allocation2 + $0xf0] sm:$0xff] }
 0x11b   : > { %1051 = vst.msk [vmem:[%s1673_s23 + $0x6c] sm:$0xf] %vm1023_vm4, %v1018_v28 }
 0x11c   : > { %1036 = vst.msk [vmem:[%s1673_s23 + $0x30] sm:$0xf] %vm1023_vm4, %v1003_v33  ;;  %v919_v36 = vld [vmem:[#allocation2 + $0xe0] sm:$0xff]  ;;  %v837_v37 = vadd.f32 %v779_v34, %v319_v31 }
 0x11d   : > { %v955_v38 = vadd.f32 %v1663_v62, %v919_v36  ;;  %v904_v58 = vld [vmem:[#allocation2 + $0x68] sm:$0xff]  ;;  %872 = vst.msk [vmem:[#allocation2 + $0x80] sm:$0xff] %vm272_vm3, %v839_v29 }
 0x11e   : > { %v940_v39 = vadd.f32 %v1663_v62, %v904_v58  ;;  %885 = vst.msk [vmem:[#allocation2 + $0xe8] sm:$0xff] %vm272_vm3, %v852_v35 }
 0x11f   : > { %v785_v42 = vpop.f32.mrf.mxu1  ;;  %v987_v43 = vmax.f32 %v955_v38, 0.0  ;;  %870 = vst.msk [vmem:[#allocation2 + $0x70] sm:$0xff] %vm272_vm3, %v837_v37  ;;  %v729_v47 = vpop.f32.mrf.mxu2 }
 0x120   : > { %v786_v44 = vadd.f32 %v785_v42, %v1668_v5  ;;  %v972_v45 = vmax.f32 %v940_v39, 0.0  ;;  %v819_v50 = vadd.f32 %v818_v40, %v729_v47 }
 0x121   : > { %v1019_v48 = vpack.c.bf16 %v987_v43, %v987_v43  ;;  %v691_v52 = vpop.f32.mrf.mxu0 }
 0x122   : > { %v840_v49 = vadd.f32 %v786_v44, %v322_v41  ;;  %v1004_v53 = vpack.c.bf16 %v972_v45, %v972_v45  ;;  %v781_v54 = vadd.f32 %v780_v2, %v691_v52  ;;  %v853_v55 = vadd.f32 %v819_v50, %v335_v46  ;;  %v820_v2 = vpop.f32.mrf.mxu3 }
 0x123   : > { %1052 = vst.msk [vmem:[%s1673_s23 + $0x70] sm:$0xf] %vm1023_vm4, %v1019_v48 }
 0x124   : > { %1037 = vst.msk [vmem:[%s1673_s23 + $0x34] sm:$0xf] %vm1023_vm4, %v1004_v53  ;;  %v907_v56 = vld [vmem:[#allocation2 + $0x80] sm:$0xff]  ;;  %v838_v57 = vadd.f32 %v781_v54, %v320_v51 }
 0x125   : > { %v943_v59 = vadd.f32 %v1663_v62, %v907_v56  ;;  %v920_v5 = vld [vmem:[#allocation2 + $0xe8] sm:$0xff]  ;;  %873 = vst.msk [vmem:[#allocation2 + $0x88] sm:$0xff] %vm272_vm3, %v840_v49 }
 0x126   : > { %v956_v60 = vadd.f32 %v1663_v62, %v920_v5  ;;  %v905_v61 = vld [vmem:[#allocation2 + $0x70] sm:$0xff]  ;;  %886 = vst.msk [vmem:[#allocation2 + $0xf0] sm:$0xff] %vm272_vm3, %v853_v55 }
 0x127   : > { %v975_v63 = vmax.f32 %v943_v59, 0.0  ;;  %v941_v0 = vadd.f32 %v1663_v62, %v905_v61  ;;  %871 = vst.msk [vmem:[#allocation2 + $0x78] sm:$0xff] %vm272_vm3, %v838_v57  ;;  %v731_v4 = vpop.f32.mrf.mxu2 }
 0x128   : > { %v988_v1 = vmax.f32 %v956_v60, 0.0  ;;  %v821_v8 = vadd.f32 %v820_v2, %v731_v4 }
 0x129   : > { %v1007_v6 = vpack.c.bf16 %v975_v63, %v975_v63  ;;  %v973_v7 = vmax.f32 %v941_v0, 0.0 }
 0x12a   : > { %v1020_v9 = vpack.c.bf16 %v988_v1, %v988_v1  ;;  %v854_v11 = vadd.f32 %v821_v8, %v336_v3 }
 0x12b   : > { %1040 = vst.msk [vmem:[%s1673_s23 + $0x40] sm:$0xf] %vm1023_vm4, %v1007_v6  ;;  %v1005_v10 = vpack.c.bf16 %v973_v7, %v973_v7 }
 0x12c   : > { %1053 = vst.msk [vmem:[%s1673_s23 + $0x74] sm:$0xf] %vm1023_vm4, %v1020_v9  ;;  %v908_v12 = vld [vmem:[#allocation2 + $0x88] sm:$0xff] }
 0x12d   : > { %1038 = vst.msk [vmem:[%s1673_s23 + $0x38] sm:$0xf] %vm1023_vm4, %v1005_v10  ;;  %v944_v13 = vadd.f32 %v1663_v62, %v908_v12  ;;  %v921_v14 = vld [vmem:[#allocation2 + $0xf0] sm:$0xff] }
 0x12e   : > { %v957_v15 = vadd.f32 %v1663_v62, %v921_v14  ;;  %v906_v16 = vld [vmem:[#allocation2 + $0x78] sm:$0xff]  ;;  %887 = vst.msk [vmem:[#allocation2 + $0xf8] sm:$0xff] %vm272_vm3, %v854_v11 }
 0x12f   : > { %v976_v17 = vmax.f32 %v944_v13, 0.0  ;;  %v942_v18 = vadd.f32 %v1663_v62, %v906_v16 }
 0x130   : > { %v989_v19 = vmax.f32 %v957_v15, 0.0 }
 0x131   : > { %v1008_v20 = vpack.c.bf16 %v976_v17, %v976_v17  ;;  %v974_v21 = vmax.f32 %v942_v18, 0.0 }
 0x132   : > { %v1021_v22 = vpack.c.bf16 %v989_v19, %v989_v19 }
 0x133   : > { %1041 = vst.msk [vmem:[%s1673_s23 + $0x44] sm:$0xf] %vm1023_vm4, %v1008_v20  ;;  %v1006_v23 = vpack.c.bf16 %v974_v21, %v974_v21 }
 0x134   : > { %1054 = vst.msk [vmem:[%s1673_s23 + $0x78] sm:$0xf] %vm1023_vm4, %v1021_v22 }
 0x135   : > { %1039 = vst.msk [vmem:[%s1673_s23 + $0x3c] sm:$0xf] %vm1023_vm4, %v1006_v23  ;;  %v922_v24 = vld [vmem:[#allocation2 + $0xf8] sm:$0xff] }
 0x136   : > { %v958_v25 = vadd.f32 %v1663_v62, %v922_v24 }
 0x138   : > { %v990_v26 = vmax.f32 %v958_v25, 0.0 }
 0x13a   : > { %v1022_v27 = vpack.c.bf16 %v990_v26, %v990_v26 }
 0x13c   : > { %1055 = vst.msk [vmem:[%s1673_s23 + $0x7c] sm:$0xf] %vm1023_vm4, %v1022_v27 }
 0x13d PF: > { %s13_s14 = sadd.s32 1, %s1465_s14   ;;  %s1815_s12 = smov %s1461_s13 }
 0x13e   : > { %p10_p5 = scmp.ge.s32.totalorder %s13_s14, 4   ;;  %s1816_s13 = smov %s1818_s15 }
 0x140   :  { %12 = sbr.rel (!%p10_p5) target bundleno = 2 (0x2), region = 76 }

</bundles_post_ra>
